<compile_context>
chip_gen: v7x
topology: tpu7x:2x2x1
jax: 0.10.0
libtpu: 0.0.40
codegen_flags: <defaults>
</compile_context>

<pallas_src>
import functools

import jax
import jax.numpy as jnp
from jax.experimental import pallas as pl
from jax.experimental.pallas import tpu as pltpu


def _round_up(x, m):
    return (x + m - 1) // m * m


def _fused_autoencoder_kernel(x_ref,
                              w0, w1, w2, w3, w4, w5,
                              b0, b1, b2, b3, b4, b5,
                              enc_ref, gen_ref):
    """One batch tile through all 6 fused Linear+Bias+ReLU layers.

    All refs are zero-padded to lane-dense (multiple-of-128) feature dims, so
    every dot / add / store is unmasked.  Zero-padded weight rows/cols and zero
    bias padding keep the padded lanes exactly zero through ReLU, so padding
    never contaminates the real lanes.
    """
    ws = (w0, w1, w2, w3, w4, w5)
    bs = (b0, b1, b2, b3, b4, b5)

    h = x_ref[...].astype(jnp.float32)
    # encoder: 3 x (matmul on MXU + bias + ReLU on VPU), activations stay in vregs
    for li in range(3):
        h = jnp.dot(h, ws[li][...], preferred_element_type=jnp.float32)
        h = jnp.maximum(h + bs[li][...], 0.0)
    enc_ref[...] = h.astype(enc_ref.dtype)

    # decoder: 3 x (matmul + bias + ReLU)
    g = h
    for li in range(3, 6):
        g = jnp.dot(g, ws[li][...], preferred_element_type=jnp.float32)
        g = jnp.maximum(g + bs[li][...], 0.0)
    gen_ref[...] = g.astype(gen_ref.dtype)


@jax.jit
def autoencoder_forward(x, params):
    """Returns (encoded, reconstruction) like the PyTorch AutoEncoder.forward.

    x: (B, flatten_dim) float32
    params: list of 6 (w, b) pairs with w: (din, dout), b: (dout,)
    """
    B, d0 = x.shape
    # true feature-dim chain: d0 -> d1 -> d2 -> d3 -> d2 -> d1 -> d0
    dims = [d0] + [w.shape[1] for (w, _) in params]
    pdims = [_round_up(d, 128) for d in dims]          # lane-dense padded dims

    # batch tile: full 128 rows when the batch is large, else round up to 8
    bm = 128 if B >= 128 else _round_up(B, 8)
    Bp = _round_up(B, bm)

    dtype = x.dtype
    # zero-pad input batch/features (padded rows/lanes are discarded at the end)
    xp = jnp.zeros((Bp, pdims[0]), dtype).at[:B, :d0].set(x)

    # zero-pad weights/biases to lane-dense shapes (done once per call in XLA)
    wps, bps = [], []
    for li, (w, b) in enumerate(params):
        din, dout = w.shape
        wp = jnp.zeros((pdims[li], pdims[li + 1]), w.dtype).at[:din, :dout].set(w)
        bp = jnp.zeros((1, pdims[li + 1]), b.dtype).at[0, :dout].set(b)
        wps.append(wp)
        bps.append(bp)

    grid = (Bp // bm,)

    in_specs = [pl.BlockSpec((bm, pdims[0]), lambda i: (i, 0))]
    # weights / biases: constant block index -> VMEM-resident across grid steps
    in_specs += [pl.BlockSpec(wp.shape, lambda i: (0, 0)) for wp in wps]
    in_specs += [pl.BlockSpec(bp.shape, lambda i: (0, 0)) for bp in bps]

    out_specs = [
        pl.BlockSpec((bm, pdims[3]), lambda i: (i, 0)),   # encoded (padded)
        pl.BlockSpec((bm, pdims[6]), lambda i: (i, 0)),   # reconstruction (padded)
    ]
    out_shape = [
        jax.ShapeDtypeStruct((Bp, pdims[3]), dtype),
        jax.ShapeDtypeStruct((Bp, pdims[6]), dtype),
    ]

    enc_p, gen_p = pl.pallas_call(
        _fused_autoencoder_kernel,
        grid=grid,
        in_specs=in_specs,
        out_specs=out_specs,
        out_shape=out_shape,
        compiler_params=pltpu.CompilerParams(
            dimension_semantics=("parallel",)),
    )(xp, *wps, *bps)

    # slice back to true shapes only at the very end (keeps kernel stores unmasked)
    return enc_p[:B, :dims[3]], gen_p[:B, :dims[6]]


def make_autoencoder_params(flatten_dim, key, dtype=jnp.float32):
    """Deterministic init mimicking the PyTorch module's layer sizes."""
    d0 = flatten_dim
    d1 = int(flatten_dim // 1.25)
    d2 = int(flatten_dim // 1.5)
    d3 = int(flatten_dim // 1.7)
    # encoder: d0->d1->d2->d3 (ReLU each); decoder: d3->d2->d1->d0 (ReLU each)
    dims = [(d0, d1), (d1, d2), (d2, d3), (d3, d2), (d2, d1), (d1, d0)]
    params = []
    for (din, dout) in dims:
        key, kw, kb = jax.random.split(key, 3)
        bound = 1.0 / jnp.sqrt(jnp.asarray(din, dtype))
        w = jax.random.uniform(kw, (din, dout), dtype, -bound, bound)
        b = jax.random.uniform(kb, (dout,), dtype, -bound, bound)
        params.append((w, b))
    return params


def _reference_forward(x, params):
    h = x
    for (w, b) in params[:3]:
        h = jnp.maximum(h @ w + b, 0.0)
    g = h
    for (w, b) in params[3:]:
        g = jnp.maximum(g @ w + b, 0.0)
    return h, g


if __name__ == "__main__":
    flatten_dim = 64
    batch = 8

    key = jax.random.PRNGKey(0)
    kx, kp = jax.random.split(key)
    x = jax.random.normal(kx, (batch, flatten_dim), jnp.float32)
    params = make_autoencoder_params(flatten_dim, kp)

    encoded, gen = autoencoder_forward(x, params)
    encoded = jax.block_until_ready(encoded)
    gen = jax.block_until_ready(gen)

    # sanity check against a pure-JAX reference
    ref_enc, ref_gen = _reference_forward(x, params)
    assert encoded.shape == (batch, int(flatten_dim // 1.7))
    assert gen.shape == (batch, flatten_dim)
    assert jnp.allclose(encoded, ref_enc, atol=1e-5, rtol=1e-5)
    assert jnp.allclose(gen, ref_gen, atol=1e-5, rtol=1e-5)

    print("KERNEL_OK")
</pallas_src>

<mosaic_0001>
module attributes {stable_mosaic.version = 11 : i64} {
  func.func @_fused_autoencoder_kernel(%arg0: i32, %arg1: memref<8x128xf32, #tpu.memory_space<vmem>>, %arg2: memref<128x128xf32, #tpu.memory_space<vmem>>, %arg3: memref<128x128xf32, #tpu.memory_space<vmem>>, %arg4: memref<128x128xf32, #tpu.memory_space<vmem>>, %arg5: memref<128x128xf32, #tpu.memory_space<vmem>>, %arg6: memref<128x128xf32, #tpu.memory_space<vmem>>, %arg7: memref<128x128xf32, #tpu.memory_space<vmem>>, %arg8: memref<1x128xf32, #tpu.memory_space<vmem>>, %arg9: memref<1x128xf32, #tpu.memory_space<vmem>>, %arg10: memref<1x128xf32, #tpu.memory_space<vmem>>, %arg11: memref<1x128xf32, #tpu.memory_space<vmem>>, %arg12: memref<1x128xf32, #tpu.memory_space<vmem>>, %arg13: memref<1x128xf32, #tpu.memory_space<vmem>>, %arg14: memref<8x128xf32, #tpu.memory_space<vmem>>, %arg15: memref<8x128xf32, #tpu.memory_space<vmem>>) attributes {dimension_semantics = [#tpu.dimension_semantics<parallel>], iteration_bounds = array<i64: 1>, scalar_prefetch = 0 : i64, scratch_operands = 0 : i64, tpu.core_type = #tpu.core_type<tc>, window_params = [{transform_indices = @transform_0, window_bounds = array<i64: 8, 128>}, {pipeline_mode = #tpu.pipeline_mode<synchronous>, transform_indices = @transform_1, window_bounds = array<i64: 128, 128>}, {pipeline_mode = #tpu.pipeline_mode<synchronous>, transform_indices = @transform_2, window_bounds = array<i64: 128, 128>}, {pipeline_mode = #tpu.pipeline_mode<synchronous>, transform_indices = @transform_3, window_bounds = array<i64: 128, 128>}, {pipeline_mode = #tpu.pipeline_mode<synchronous>, transform_indices = @transform_4, window_bounds = array<i64: 128, 128>}, {pipeline_mode = #tpu.pipeline_mode<synchronous>, transform_indices = @transform_5, window_bounds = array<i64: 128, 128>}, {pipeline_mode = #tpu.pipeline_mode<synchronous>, transform_indices = @transform_6, window_bounds = array<i64: 128, 128>}, {pipeline_mode = #tpu.pipeline_mode<synchronous>, transform_indices = @transform_7, window_bounds = array<i64: 1, 128>}, {pipeline_mode = #tpu.pipeline_mode<synchronous>, transform_indices = @transform_8, window_bounds = array<i64: 1, 128>}, {pipeline_mode = #tpu.pipeline_mode<synchronous>, transform_indices = @transform_9, window_bounds = array<i64: 1, 128>}, {pipeline_mode = #tpu.pipeline_mode<synchronous>, transform_indices = @transform_10, window_bounds = array<i64: 1, 128>}, {pipeline_mode = #tpu.pipeline_mode<synchronous>, transform_indices = @transform_11, window_bounds = array<i64: 1, 128>}, {pipeline_mode = #tpu.pipeline_mode<synchronous>, transform_indices = @transform_12, window_bounds = array<i64: 1, 128>}, {transform_indices = @transform_13, window_bounds = array<i64: 8, 128>}, {transform_indices = @transform_14, window_bounds = array<i64: 8, 128>}]} {
    %c0 = arith.constant 0 : index
    %c0_0 = arith.constant 0 : index
    %0 = vector.load %arg1[%c0, %c0_0] : memref<8x128xf32, #tpu.memory_space<vmem>>, vector<8x128xf32>
    %c0_1 = arith.constant 0 : index
    %c0_2 = arith.constant 0 : index
    %1 = vector.load %arg2[%c0_1, %c0_2] : memref<128x128xf32, #tpu.memory_space<vmem>>, vector<128x128xf32>
    %cst = arith.constant dense<0.000000e+00> : vector<8x128xf32>
    %2 = tpu.matmul %0, %1, %cst {dimension_numbers = #tpu.dot_dimension_numbers<[1], [0], [0], [1], [0, 0, 1, 1], [], []>} : vector<8x128xf32>, vector<128x128xf32>, vector<8x128xf32> -> vector<8x128xf32>
    %c0_3 = arith.constant 0 : index
    %c0_4 = arith.constant 0 : index
    %3 = vector.load %arg8[%c0_3, %c0_4] : memref<1x128xf32, #tpu.memory_space<vmem>>, vector<1x128xf32>
    %4 = vector.broadcast %3 : vector<1x128xf32> to vector<8x128xf32>
    %5 = arith.addf %2, %4 : vector<8x128xf32>
    %cst_5 = arith.constant 0.000000e+00 : f32
    %6 = vector.broadcast %cst_5 : f32 to vector<8x128xf32>
    %7 = arith.maximumf %5, %6 : vector<8x128xf32>
    %c0_6 = arith.constant 0 : index
    %c0_7 = arith.constant 0 : index
    %8 = vector.load %arg3[%c0_6, %c0_7] : memref<128x128xf32, #tpu.memory_space<vmem>>, vector<128x128xf32>
    %cst_8 = arith.constant dense<0.000000e+00> : vector<8x128xf32>
    %9 = tpu.matmul %7, %8, %cst_8 {dimension_numbers = #tpu.dot_dimension_numbers<[1], [0], [0], [1], [0, 0, 1, 1], [], []>} : vector<8x128xf32>, vector<128x128xf32>, vector<8x128xf32> -> vector<8x128xf32>
    %c0_9 = arith.constant 0 : index
    %c0_10 = arith.constant 0 : index
    %10 = vector.load %arg9[%c0_9, %c0_10] : memref<1x128xf32, #tpu.memory_space<vmem>>, vector<1x128xf32>
    %11 = vector.broadcast %10 : vector<1x128xf32> to vector<8x128xf32>
    %12 = arith.addf %9, %11 : vector<8x128xf32>
    %cst_11 = arith.constant 0.000000e+00 : f32
    %13 = vector.broadcast %cst_11 : f32 to vector<8x128xf32>
    %14 = arith.maximumf %12, %13 : vector<8x128xf32>
    %c0_12 = arith.constant 0 : index
    %c0_13 = arith.constant 0 : index
    %15 = vector.load %arg4[%c0_12, %c0_13] : memref<128x128xf32, #tpu.memory_space<vmem>>, vector<128x128xf32>
    %cst_14 = arith.constant dense<0.000000e+00> : vector<8x128xf32>
    %16 = tpu.matmul %14, %15, %cst_14 {dimension_numbers = #tpu.dot_dimension_numbers<[1], [0], [0], [1], [0, 0, 1, 1], [], []>} : vector<8x128xf32>, vector<128x128xf32>, vector<8x128xf32> -> vector<8x128xf32>
    %c0_15 = arith.constant 0 : index
    %c0_16 = arith.constant 0 : index
    %17 = vector.load %arg10[%c0_15, %c0_16] : memref<1x128xf32, #tpu.memory_space<vmem>>, vector<1x128xf32>
    %18 = vector.broadcast %17 : vector<1x128xf32> to vector<8x128xf32>
    %19 = arith.addf %16, %18 : vector<8x128xf32>
    %cst_17 = arith.constant 0.000000e+00 : f32
    %20 = vector.broadcast %cst_17 : f32 to vector<8x128xf32>
    %21 = arith.maximumf %19, %20 : vector<8x128xf32>
    %c0_18 = arith.constant 0 : index
    %c0_19 = arith.constant 0 : index
    %22 = vector.load %arg14[%c0_18, %c0_19] : memref<8x128xf32, #tpu.memory_space<vmem>>, vector<8x128xf32>
    tpu.vector_store %arg14[%c0_18, %c0_19], %21 {strides = array<i32>} : memref<8x128xf32, #tpu.memory_space<vmem>>, vector<8x128xf32>,
    %c0_20 = arith.constant 0 : index
    %c0_21 = arith.constant 0 : index
    %23 = vector.load %arg5[%c0_20, %c0_21] : memref<128x128xf32, #tpu.memory_space<vmem>>, vector<128x128xf32>
    %cst_22 = arith.constant dense<0.000000e+00> : vector<8x128xf32>
    %24 = tpu.matmul %21, %23, %cst_22 {dimension_numbers = #tpu.dot_dimension_numbers<[1], [0], [0], [1], [0, 0, 1, 1], [], []>} : vector<8x128xf32>, vector<128x128xf32>, vector<8x128xf32> -> vector<8x128xf32>
    %c0_23 = arith.constant 0 : index
    %c0_24 = arith.constant 0 : index
    %25 = vector.load %arg11[%c0_23, %c0_24] : memref<1x128xf32, #tpu.memory_space<vmem>>, vector<1x128xf32>
    %26 = vector.broadcast %25 : vector<1x128xf32> to vector<8x128xf32>
    %27 = arith.addf %24, %26 : vector<8x128xf32>
    %cst_25 = arith.constant 0.000000e+00 : f32
    %28 = vector.broadcast %cst_25 : f32 to vector<8x128xf32>
    %29 = arith.maximumf %27, %28 : vector<8x128xf32>
    %c0_26 = arith.constant 0 : index
    %c0_27 = arith.constant 0 : index
    %30 = vector.load %arg6[%c0_26, %c0_27] : memref<128x128xf32, #tpu.memory_space<vmem>>, vector<128x128xf32>
    %cst_28 = arith.constant dense<0.000000e+00> : vector<8x128xf32>
    %31 = tpu.matmul %29, %30, %cst_28 {dimension_numbers = #tpu.dot_dimension_numbers<[1], [0], [0], [1], [0, 0, 1, 1], [], []>} : vector<8x128xf32>, vector<128x128xf32>, vector<8x128xf32> -> vector<8x128xf32>
    %c0_29 = arith.constant 0 : index
    %c0_30 = arith.constant 0 : index
    %32 = vector.load %arg12[%c0_29, %c0_30] : memref<1x128xf32, #tpu.memory_space<vmem>>, vector<1x128xf32>
    %33 = vector.broadcast %32 : vector<1x128xf32> to vector<8x128xf32>
    %34 = arith.addf %31, %33 : vector<8x128xf32>
    %cst_31 = arith.constant 0.000000e+00 : f32
    %35 = vector.broadcast %cst_31 : f32 to vector<8x128xf32>
    %36 = arith.maximumf %34, %35 : vector<8x128xf32>
    %c0_32 = arith.constant 0 : index
    %c0_33 = arith.constant 0 : index
    %37 = vector.load %arg7[%c0_32, %c0_33] : memref<128x128xf32, #tpu.memory_space<vmem>>, vector<128x128xf32>
    %cst_34 = arith.constant dense<0.000000e+00> : vector<8x128xf32>
    %38 = tpu.matmul %36, %37, %cst_34 {dimension_numbers = #tpu.dot_dimension_numbers<[1], [0], [0], [1], [0, 0, 1, 1], [], []>} : vector<8x128xf32>, vector<128x128xf32>, vector<8x128xf32> -> vector<8x128xf32>
    %c0_35 = arith.constant 0 : index
    %c0_36 = arith.constant 0 : index
    %39 = vector.load %arg13[%c0_35, %c0_36] : memref<1x128xf32, #tpu.memory_space<vmem>>, vector<1x128xf32>
    %40 = vector.broadcast %39 : vector<1x128xf32> to vector<8x128xf32>
    %41 = arith.addf %38, %40 : vector<8x128xf32>
    %cst_37 = arith.constant 0.000000e+00 : f32
    %42 = vector.broadcast %cst_37 : f32 to vector<8x128xf32>
    %43 = arith.maximumf %41, %42 : vector<8x128xf32>
    %c0_38 = arith.constant 0 : index
    %c0_39 = arith.constant 0 : index
    %44 = vector.load %arg15[%c0_38, %c0_39] : memref<8x128xf32, #tpu.memory_space<vmem>>, vector<8x128xf32>
    tpu.vector_store %arg15[%c0_38, %c0_39], %43 {strides = array<i32>} : memref<8x128xf32, #tpu.memory_space<vmem>>, vector<8x128xf32>,
    return
  }
  func.func @transform_0(%arg0: i32) -> (i32, i32) {
    %c0_i32 = arith.constant 0 : i32
    %c0_i32_0 = arith.constant 0 : i32
    return %arg0, %c0_i32 : i32, i32
  }
  func.func @transform_1(%arg0: i32) -> (i32, i32) {
    %c0_i32 = arith.constant 0 : i32
    %c0_i32_0 = arith.constant 0 : i32
    %c0_i32_1 = arith.constant 0 : i32
    return %c0_i32, %c0_i32_0 : i32, i32
  }
  func.func @transform_2(%arg0: i32) -> (i32, i32) {
    %c0_i32 = arith.constant 0 : i32
    %c0_i32_0 = arith.constant 0 : i32
    %c0_i32_1 = arith.constant 0 : i32
    return %c0_i32, %c0_i32_0 : i32, i32
  }
  func.func @transform_3(%arg0: i32) -> (i32, i32) {
    %c0_i32 = arith.constant 0 : i32
    %c0_i32_0 = arith.constant 0 : i32
    %c0_i32_1 = arith.constant 0 : i32
    return %c0_i32, %c0_i32_0 : i32, i32
  }
  func.func @transform_4(%arg0: i32) -> (i32, i32) {
    %c0_i32 = arith.constant 0 : i32
    %c0_i32_0 = arith.constant 0 : i32
    %c0_i32_1 = arith.constant 0 : i32
    return %c0_i32, %c0_i32_0 : i32, i32
  }
  func.func @transform_5(%arg0: i32) -> (i32, i32) {
    %c0_i32 = arith.constant 0 : i32
    %c0_i32_0 = arith.constant 0 : i32
    %c0_i32_1 = arith.constant 0 : i32
    return %c0_i32, %c0_i32_0 : i32, i32
  }
  func.func @transform_6(%arg0: i32) -> (i32, i32) {
    %c0_i32 = arith.constant 0 : i32
    %c0_i32_0 = arith.constant 0 : i32
    %c0_i32_1 = arith.constant 0 : i32
    return %c0_i32, %c0_i32_0 : i32, i32
  }
  func.func @transform_7(%arg0: i32) -> (i32, i32) {
    %c0_i32 = arith.constant 0 : i32
    %c0_i32_0 = arith.constant 0 : i32
    %c0_i32_1 = arith.constant 0 : i32
    return %c0_i32, %c0_i32_0 : i32, i32
  }
  func.func @transform_8(%arg0: i32) -> (i32, i32) {
    %c0_i32 = arith.constant 0 : i32
    %c0_i32_0 = arith.constant 0 : i32
    %c0_i32_1 = arith.constant 0 : i32
    return %c0_i32, %c0_i32_0 : i32, i32
  }
  func.func @transform_9(%arg0: i32) -> (i32, i32) {
    %c0_i32 = arith.constant 0 : i32
    %c0_i32_0 = arith.constant 0 : i32
    %c0_i32_1 = arith.constant 0 : i32
    return %c0_i32, %c0_i32_0 : i32, i32
  }
  func.func @transform_10(%arg0: i32) -> (i32, i32) {
    %c0_i32 = arith.constant 0 : i32
    %c0_i32_0 = arith.constant 0 : i32
    %c0_i32_1 = arith.constant 0 : i32
    return %c0_i32, %c0_i32_0 : i32, i32
  }
  func.func @transform_11(%arg0: i32) -> (i32, i32) {
    %c0_i32 = arith.constant 0 : i32
    %c0_i32_0 = arith.constant 0 : i32
    %c0_i32_1 = arith.constant 0 : i32
    return %c0_i32, %c0_i32_0 : i32, i32
  }
  func.func @transform_12(%arg0: i32) -> (i32, i32) {
    %c0_i32 = arith.constant 0 : i32
    %c0_i32_0 = arith.constant 0 : i32
    %c0_i32_1 = arith.constant 0 : i32
    return %c0_i32, %c0_i32_0 : i32, i32
  }
  func.func @transform_13(%arg0: i32) -> (i32, i32) {
    %c0_i32 = arith.constant 0 : i32
    %c0_i32_0 = arith.constant 0 : i32
    return %arg0, %c0_i32 : i32, i32
  }
  func.func @transform_14(%arg0: i32) -> (i32, i32) {
    %c0_i32 = arith.constant 0 : i32
    %c0_i32_0 = arith.constant 0 : i32
    return %arg0, %c0_i32 : i32, i32
  }
}

</mosaic_0001>

<bundles_post_ra>
// kernel: autoencoder_forward.1
= control target key start
LH: loop header
LB: loop body
LE: loop exit
PB: predicated region body
PF: predicated region fallthrough
CT: control target
= control target key end

     0   :  { %20 = vsyncpa [#allocation3], 0  ;;  %v1158_v3 = vmov 0.0|0.0   ;;  %vm1159_vm0 = vmmov 0   ;;  %v1160_v6 = vmov 0.0   ;;  %s1631_s0 = inlined_call_operand.vmem [shape: f32[8,128], index: 0, kind: input, shape index: {}]   ;;  %s1632_s1 = inlined_call_operand.vmem [shape: f32[128,128], index: 1, kind: input, shape index: {}]   ;;  %s1633_s2 = inlined_call_operand.vmem [shape: f32[128,128], index: 2, kind: input, shape index: {}]   ;;  %s1634_s3 = inlined_call_operand.vmem [shape: f32[128,128], index: 3, kind: input, shape index: {}]   ;;  %s1635_s4 = inlined_call_operand.vmem [shape: f32[128,128], index: 4, kind: input, shape index: {}]   ;;  %s1636_s5 = inlined_call_operand.vmem [shape: f32[128,128], index: 5, kind: input, shape index: {}]   ;;  %s1637_s6 = inlined_call_operand.vmem [shape: f32[128,128], index: 6, kind: input, shape index: {}]   ;;  %s1638_s7 = inlined_call_operand.vmem [shape: f32[1,128], index: 7, kind: input, shape index: {}]   ;;  %s1639_s8 = inlined_call_operand.vmem [shape: f32[1,128], index: 8, kind: input, shape index: {}]   ;;  %s1640_s9 = inlined_call_operand.vmem [shape: f32[1,128], index: 9, kind: input, shape index: {}]   ;;  %s1641_s10 = inlined_call_operand.vmem [shape: f32[1,128], index: 10, kind: input, shape index: {}]   ;;  %s1642_s11 = inlined_call_operand.vmem [shape: f32[1,128], index: 11, kind: input, shape index: {}]   ;;  %s1643_s12 = inlined_call_operand.vmem [shape: f32[1,128], index: 12, kind: input, shape index: {}]   ;;  %s1644_s13 = inlined_call_operand.hbm [shape: f32[8,128], index: 13, kind: output, shape index: {0}]   ;;  %s1645_s14 = inlined_call_operand.hbm [shape: f32[8,128], index: 14, kind: output, shape index: {1}]  }
   0x1   :  { %v49_v0 = vld [vmem:[%s1632_s1] sm:$0xff]  ;;  %v50_v1 = vld [vmem:[%s1632_s1 + $0x8] sm:$0xff]  ;;  %v51_v2 = vld [vmem:[%s1632_s1 + $0x10] sm:$0xff]  ;;  %961 = vmatprep.subr.bf16.mxu0 %v1158_v3  ;;  %783 = vmatprep.mubr.msk.f32.mxu0 %vm1159_vm0, %v1160_v6 }
   0x2   :  { %v962_v4 = vpack.c.bf16 %v50_v1, %v49_v0  ;;  %v52_v5 = vld [vmem:[%s1632_s1 + $0x18] sm:$0xff]  ;;  %985 = vmatprep.subr.bf16.mxu1 %v1158_v3  ;;  %818 = vmatprep.mubr.msk.f32.mxu1 %vm1159_vm0, %v1160_v6  ;;  %v53_v8 = vld [vmem:[%s1632_s1 + $0x20] sm:$0xff]  ;;  %v54_v9 = vld [vmem:[%s1632_s1 + $0x28] sm:$0xff] }
   0x3   :  { %v965_v7 = vpack.c.bf16 %v52_v5, %v51_v2  ;;  %v143_v10 = vld [vmem:[%s1633_s2] sm:$0xff]  ;;  %v144_v11 = vld [vmem:[%s1633_s2 + $0x8] sm:$0xff]  ;;  %v145_v12 = vld [vmem:[%s1633_s2 + $0x10] sm:$0xff]  ;;  %v968_v14 = vpack.c.bf16 %v54_v9, %v53_v8 }
   0x4   :  { %963 = vmatpush3.bf16.msra.mxu0 %v962_v4  ;;  %v146_v13 = vld [vmem:[%s1633_s2 + $0x18] sm:$0xff]  ;;  %v986_v15 = vpack.c.bf16 %v144_v11, %v143_v10  ;;  %v55_v16 = vld [vmem:[%s1632_s1 + $0x30] sm:$0xff]  ;;  %v147_v19 = vld [vmem:[%s1633_s2 + $0x20] sm:$0xff] }
   0x5   :  { %964 = vmatprep.subr.bf16.mxu0 %v1158_v3  ;;  %v56_v17 = vld [vmem:[%s1632_s1 + $0x38] sm:$0xff]  ;;  %v989_v18 = vpack.c.bf16 %v146_v13, %v145_v12  ;;  %v148_v20 = vld [vmem:[%s1633_s2 + $0x28] sm:$0xff] }
   0x6   :  { %987 = vmatpush3.bf16.msra.mxu1 %v986_v15 }
   0x7   :  { %988 = vmatprep.subr.bf16.mxu1 %v1158_v3 }
   0x8   :  { %966 = vmatpush3.bf16.msra.mxu0 %v965_v7 }
   0x9   :  { %967 = vmatprep.subr.bf16.mxu0 %v1158_v3 }
   0xa   :  { %21 = vsyncpa [#allocation5], 0  ;;  %v971_v21 = vpack.c.bf16 %v56_v17, %v55_v16  ;;  %v57_v22 = vld [vmem:[%s1632_s1 + $0x40] sm:$0xff]  ;;  %v58_v23 = vld [vmem:[%s1632_s1 + $0x48] sm:$0xff]  ;;  %990 = vmatpush3.bf16.msra.mxu1 %v989_v18  ;;  %v992_v24 = vpack.c.bf16 %v148_v20, %v147_v19 }
   0xb   :  { %991 = vmatprep.subr.bf16.mxu1 %v1158_v3  ;;  %v149_v25 = vld [vmem:[%s1633_s2 + $0x30] sm:$0xff]  ;;  %v150_v26 = vld [vmem:[%s1633_s2 + $0x38] sm:$0xff]  ;;  %v974_v27 = vpack.c.bf16 %v58_v23, %v57_v22  ;;  %v151_v31 = vld [vmem:[%s1633_s2 + $0x40] sm:$0xff] }
   0xc   :  { %969 = vmatpush3.bf16.msra.mxu0 %v968_v14  ;;  %v59_v28 = vld [vmem:[%s1632_s1 + $0x50] sm:$0xff]  ;;  %v60_v29 = vld [vmem:[%s1632_s1 + $0x58] sm:$0xff]  ;;  %v995_v30 = vpack.c.bf16 %v150_v26, %v149_v25  ;;  %v152_v32 = vld [vmem:[%s1633_s2 + $0x48] sm:$0xff] }
   0xd   :  { %970 = vmatprep.subr.bf16.mxu0 %v1158_v3  ;;  %v977_v33 = vpack.c.bf16 %v60_v29, %v59_v28  ;;  %v61_v34 = vld [vmem:[%s1632_s1 + $0x60] sm:$0xff]  ;;  %v62_v35 = vld [vmem:[%s1632_s1 + $0x68] sm:$0xff]  ;;  %v998_v36 = vpack.c.bf16 %v152_v32, %v151_v31  ;;  %v153_v37 = vld [vmem:[%s1633_s2 + $0x50] sm:$0xff] }
   0xe   :  { %993 = vmatpush3.bf16.msra.mxu1 %v992_v24  ;;  %v154_v38 = vld [vmem:[%s1633_s2 + $0x58] sm:$0xff]  ;;  %v980_v39 = vpack.c.bf16 %v62_v35, %v61_v34  ;;  %v63_v40 = vld [vmem:[%s1632_s1 + $0x70] sm:$0xff]  ;;  %v155_v43 = vld [vmem:[%s1633_s2 + $0x60] sm:$0xff] }
   0xf   :  { %994 = vmatprep.subr.bf16.mxu1 %v1158_v3  ;;  %v64_v41 = vld [vmem:[%s1632_s1 + $0x78] sm:$0xff]  ;;  %v1001_v42 = vpack.c.bf16 %v154_v38, %v153_v37  ;;  %v156_v44 = vld [vmem:[%s1633_s2 + $0x68] sm:$0xff]  ;;  %v48_v47 = vld [vmem:[%s1631_s0] sm:$0xff] }
  0x10   :  { %972 = vmatpush3.bf16.msra.mxu0 %v971_v21  ;;  %v983_v45 = vpack.c.bf16 %v64_v41, %v63_v40  ;;  %v1004_v46 = vpack.c.bf16 %v156_v44, %v155_v43  ;;  %v157_v48 = vld [vmem:[%s1633_s2 + $0x70] sm:$0xff]  ;;  %v158_v49 = vld [vmem:[%s1633_s2 + $0x78] sm:$0xff]  ;;  %v237_v51 = vld [vmem:[%s1634_s3] sm:$0xff] }
  0x11   :  { %973 = vmatprep.subr.bf16.mxu0 %v1158_v3  ;;  %v1007_v50 = vpack.c.bf16 %v158_v49, %v157_v48  ;;  %v238_v52 = vld [vmem:[%s1634_s3 + $0x8] sm:$0xff]  ;;  %v239_v53 = vld [vmem:[%s1634_s3 + $0x10] sm:$0xff]  ;;  %v240_v55 = vld [vmem:[%s1634_s3 + $0x18] sm:$0xff] }
  0x12   :  { %996 = vmatpush3.bf16.msra.mxu1 %v995_v30  ;;  %v1010_v54 = vpack.c.bf16 %v238_v52, %v237_v51  ;;  %v1013_v56 = vpack.c.bf16 %v240_v55, %v239_v53  ;;  %v241_v57 = vld [vmem:[%s1634_s3 + $0x20] sm:$0xff]  ;;  %v242_v58 = vld [vmem:[%s1634_s3 + $0x28] sm:$0xff]  ;;  %v243_v60 = vld [vmem:[%s1634_s3 + $0x30] sm:$0xff] }
  0x13   :  { %997 = vmatprep.subr.bf16.mxu1 %v1158_v3  ;;  %v1016_v59 = vpack.c.bf16 %v242_v58, %v241_v57  ;;  %v244_v61 = vld [vmem:[%s1634_s3 + $0x38] sm:$0xff]  ;;  %v245_v63 = vld [vmem:[%s1634_s3 + $0x40] sm:$0xff]  ;;  %v246_v0 = vld [vmem:[%s1634_s3 + $0x48] sm:$0xff] }
  0x14   :  { %975 = vmatpush3.bf16.msra.mxu0 %v974_v27  ;;  %v1019_v62 = vpack.c.bf16 %v244_v61, %v243_v60  ;;  %v1022_v1 = vpack.c.bf16 %v246_v0, %v245_v63  ;;  %v247_v2 = vld [vmem:[%s1634_s3 + $0x50] sm:$0xff]  ;;  %v248_v4 = vld [vmem:[%s1634_s3 + $0x58] sm:$0xff]  ;;  %v249_v7 = vld [vmem:[%s1634_s3 + $0x60] sm:$0xff] }
  0x15   :  { %976 = vmatprep.subr.bf16.mxu0 %v1158_v3  ;;  %v1025_v5 = vpack.c.bf16 %v248_v4, %v247_v2  ;;  %v250_v8 = vld [vmem:[%s1634_s3 + $0x68] sm:$0xff]  ;;  %v643_v10 = vld [vmem:[%s1638_s7] ss:$0 sm:$0xff]  ;;  %v251_v15 = vld [vmem:[%s1634_s3 + $0x70] sm:$0xff] }
  0x16   :  { %999 = vmatpush3.bf16.msra.mxu1 %v998_v36  ;;  %v1028_v9 = vpack.c.bf16 %v250_v8, %v249_v7  ;;  %v252_v16 = vld [vmem:[%s1634_s3 + $0x78] sm:$0xff]  ;;  %v332_v18 = vld [vmem:[%s1635_s4] sm:$0xff]  ;;  %v333_v19 = vld [vmem:[%s1635_s4 + $0x8] sm:$0xff] }
  0x17   :  { %1000 = vmatprep.subr.bf16.mxu1 %v1158_v3  ;;  %v1031_v17 = vpack.c.bf16 %v252_v16, %v251_v15  ;;  %v334_v20 = vld [vmem:[%s1635_s4 + $0x10] sm:$0xff]  ;;  %v1034_v21 = vpack.c.bf16 %v333_v19, %v332_v18  ;;  %v335_v22 = vld [vmem:[%s1635_s4 + $0x18] sm:$0xff]  ;;  %v336_v24 = vld [vmem:[%s1635_s4 + $0x20] sm:$0xff] }
  0x18   :  { %978 = vmatpush3.bf16.msra.mxu0 %v977_v33  ;;  %v1037_v23 = vpack.c.bf16 %v335_v22, %v334_v20  ;;  %v337_v25 = vld [vmem:[%s1635_s4 + $0x28] sm:$0xff]  ;;  %v338_v27 = vld [vmem:[%s1635_s4 + $0x30] sm:$0xff]  ;;  %v339_v28 = vld [vmem:[%s1635_s4 + $0x38] sm:$0xff] }
  0x19   :  { %979 = vmatprep.subr.bf16.mxu0 %v1158_v3  ;;  %v1040_v26 = vpack.c.bf16 %v337_v25, %v336_v24  ;;  %v1043_v29 = vpack.c.bf16 %v339_v28, %v338_v27  ;;  %v340_v30 = vld [vmem:[%s1635_s4 + $0x40] sm:$0xff]  ;;  %v341_v31 = vld [vmem:[%s1635_s4 + $0x48] sm:$0xff]  ;;  %v342_v33 = vld [vmem:[%s1635_s4 + $0x50] sm:$0xff] }
  0x1a   :  { %1002 = vmatpush3.bf16.msra.mxu1 %v1001_v42  ;;  %v1046_v32 = vpack.c.bf16 %v341_v31, %v340_v30  ;;  %v343_v34 = vld [vmem:[%s1635_s4 + $0x58] sm:$0xff]  ;;  %v344_v36 = vld [vmem:[%s1635_s4 + $0x60] sm:$0xff]  ;;  %v345_v37 = vld [vmem:[%s1635_s4 + $0x68] sm:$0xff] }
  0x1b   :  { %1003 = vmatprep.subr.bf16.mxu1 %v1158_v3  ;;  %v1049_v35 = vpack.c.bf16 %v343_v34, %v342_v33  ;;  %v1052_v38 = vpack.c.bf16 %v345_v37, %v344_v36  ;;  %v346_v44 = vld [vmem:[%s1635_s4 + $0x70] sm:$0xff]  ;;  %v427_v48 = vld [vmem:[%s1636_s5 + $0x8] sm:$0xff]  ;;  %v429_v51 = vld [vmem:[%s1636_s5 + $0x18] sm:$0xff] }
  0x1c   :  { %981 = vmatpush3.bf16.msra.mxu0 %v980_v39  ;;  %v644_v39 = vld [vmem:[%s1639_s8] ss:$0 sm:$0xff]  ;;  %v428_v49 = vld [vmem:[%s1636_s5 + $0x10] sm:$0xff]  ;;  %v433_v57 = vld [vmem:[%s1636_s5 + $0x38] sm:$0xff] }
  0x1d   :  { %982 = vmatprep.subr.bf16.mxu0 %v1158_v3  ;;  %v1061_v52 = vpack.c.bf16 %v429_v51, %v428_v49  ;;  %v430_v53 = vld [vmem:[%s1636_s5 + $0x20] sm:$0xff]  ;;  %v435_v60 = vld [vmem:[%s1636_s5 + $0x48] sm:$0xff]  ;;  %v437_v63 = vld [vmem:[%s1636_s5 + $0x58] sm:$0xff] }
  0x1e   :  { %1005 = vmatpush3.bf16.msra.mxu1 %v1004_v46  ;;  %v439_v2 = vld [vmem:[%s1636_s5 + $0x68] sm:$0xff]  ;;  %v524_v19 = vld [vmem:[%s1637_s6 + $0x20] sm:$0xff]  ;;  %v526_v22 = vld [vmem:[%s1637_s6 + $0x30] sm:$0xff] }
  0x1f   :  { %1006 = vmatprep.subr.bf16.mxu1 %v1158_v3  ;;  %v521_v15 = vld [vmem:[%s1637_s6 + $0x8] sm:$0xff]  ;;  %v528_v25 = vld [vmem:[%s1637_s6 + $0x40] sm:$0xff]  ;;  %v530_v28 = vld [vmem:[%s1637_s6 + $0x50] sm:$0xff] }
  0x20   :  { %984 = vmatpush3.bf16.msra.mxu0 %v983_v45  ;;  %v347_v45 = vld [vmem:[%s1635_s4 + $0x78] sm:$0xff]  ;;  %v525_v20 = vld [vmem:[%s1637_s6 + $0x28] sm:$0xff]  ;;  %v532_v31 = vld [vmem:[%s1637_s6 + $0x60] sm:$0xff] }
  0x21   :  { %1009 = vmatprep.subr.bf16.mxu0 %v1158_v3  ;;  %v1055_v46 = vpack.c.bf16 %v347_v45, %v346_v44  ;;  %v646_v34 = vld [vmem:[%s1641_s10] ss:$0 sm:$0xff]  ;;  %s1161_s10 = smov [#allocation2]  }
  0x22   :  { %1008 = vmatpush3.bf16.msra.mxu1 %v1007_v50  ;;  %s621_s17 = sshll.u32 %s1161_s10, 4  ;;  %s622_s17 = int_to_ptr.vmem [resolvable:$true] %s621_s17 }
  0x23   :  { %784 = vmatmul.mubr.f32.vlgmr.msra.gmra.mrb[0].mxu0 %v48_v47  ;;  %1033 = vmatprep.subr.bf16.mxu1 %v1158_v3  ;;  %v426_v47 = vld [vmem:[%s1636_s5] sm:$0xff]  ;;  %s1110_s18 = scalar_lea.vmem %s622_s17, 128  ;;  %p1115_p1 = scmp.lt.s32.totalorder %s622_s17, %s622_s17 }
  0x24   :  { %853 = vmatprep.mubr.msk.f32.mxu0 %vm1159_vm0, %v1160_v6  ;;  %1011 = vmatpush3.bf16.msra.mxu0 %v1010_v54  ;;  %v1058_v50 = vpack.c.bf16 %v427_v48, %v426_v47  ;;  %v431_v54 = vld [vmem:[%s1636_s5 + $0x28] sm:$0xff]  ;;  %p1111_p0 = scmp.ne.s32.totalorder %s622_s17, %s1110_s18  ;;  %p1116_p2 = scmp.lt.s32.totalorder %s1110_s18, %s1110_s18 }
  0x25   :  { %1012 = vmatprep.subr.bf16.mxu0 %v1158_v3  ;;  %v1064_v55 = vpack.c.bf16 %v431_v54, %v430_v53 }
  0x26   :  { %p1117_p3 = por %p1116_p2, %p1115_p1 }
  0x28   :  { %1014 = vmatpush3.bf16.msra.mxu0 %v1013_v56  ;;  %v432_v56 = vld [vmem:[%s1636_s5 + $0x30] sm:$0xff]  ;;  %p1118_p4 = pnand %p1117_p3, %p1111_p0 }
  0x29   :  { %1015 = vmatprep.subr.bf16.mxu0 %v1158_v3  ;;  %v1067_v58 = vpack.c.bf16 %v433_v57, %v432_v56 }
  0x2c   :  { %1017 = vmatpush3.bf16.msra.mxu0 %v1016_v59  ;;  %v434_v59 = vld [vmem:[%s1636_s5 + $0x40] sm:$0xff] }
  0x2d   :  { %1018 = vmatprep.subr.bf16.mxu0 %v1158_v3  ;;  %v1070_v61 = vpack.c.bf16 %v435_v60, %v434_v59 }
  0x30   :  { %1020 = vmatpush3.bf16.msra.mxu0 %v1019_v62  ;;  %v436_v62 = vld [vmem:[%s1636_s5 + $0x50] sm:$0xff] }
  0x31   :  { %1021 = vmatprep.subr.bf16.mxu0 %v1158_v3  ;;  %v1073_v0 = vpack.c.bf16 %v437_v63, %v436_v62 }
  0x34   :  { %1023 = vmatpush3.bf16.msra.mxu0 %v1022_v1  ;;  %v438_v1 = vld [vmem:[%s1636_s5 + $0x60] sm:$0xff] }
  0x35   :  { %1024 = vmatprep.subr.bf16.mxu0 %v1158_v3  ;;  %v1076_v4 = vpack.c.bf16 %v439_v2, %v438_v1 }
  0x38   :  { %1026 = vmatpush3.bf16.msra.mxu0 %v1025_v5  ;;  %v645_v5 = vld [vmem:[%s1640_s9] ss:$0 sm:$0xff] }
  0x39   :  { %1027 = vmatprep.subr.bf16.mxu0 %v1158_v3 }
  0x3c   :  { %1029 = vmatpush3.bf16.msra.mxu0 %v1028_v9 }
  0x3d   :  { %1030 = vmatprep.subr.bf16.mxu0 %v1158_v3 }
  0x40   :  { %1032 = vmatpush3.bf16.msra.mxu0 %v1031_v17  ;;  %v523_v17 = vld [vmem:[%s1637_s6 + $0x18] sm:$0xff] }
  0x41   :  { %1057 = vmatprep.subr.bf16.mxu0 %v1158_v3 }
  0xf6   :  { %v138_v11 = vpop.f32.mrb[0].mxu0 }
  0xf7   :  { %v139_v12 = vadd.f32 %v643_v10, %v138_v11  ;;  %v785_v13 = vpop.f32.mrb[1].mxu0  ;;  %v440_v11 = vld [vmem:[%s1636_s5 + $0x70] sm:$0xff] }
  0xf9   :  { %v142_v14 = vmax.f32 %v139_v12, 0.0  ;;  %v441_v12 = vld [vmem:[%s1636_s5 + $0x78] sm:$0xff] }
  0xfa   :  { %v1079_v13 = vpack.c.bf16 %v441_v12, %v440_v11 }
  0xfb   :  { %819 = vmatmul.mubr.f32.vlgmr.msra.gmra.mrb[0].mxu1 %v142_v14  ;;  %v520_v14 = vld [vmem:[%s1637_s6] sm:$0xff] }
  0xfc   :  { %888 = vmatprep.mubr.msk.f32.mxu1 %vm1159_vm0, %v1160_v6  ;;  %1035 = vmatpush3.bf16.msra.mxu1 %v1034_v21  ;;  %v1082_v16 = vpack.c.bf16 %v521_v15, %v520_v14  ;;  %v1088_v21 = vpack.c.bf16 %v525_v20, %v524_v19 }
  0xfd   :  { %1036 = vmatprep.subr.bf16.mxu1 %v1158_v3 }
 0x100   :  { %1038 = vmatpush3.bf16.msra.mxu1 %v1037_v23  ;;  %v527_v23 = vld [vmem:[%s1637_s6 + $0x38] sm:$0xff] }
 0x101   :  { %1039 = vmatprep.subr.bf16.mxu1 %v1158_v3  ;;  %v1091_v24 = vpack.c.bf16 %v527_v23, %v526_v22 }
 0x104   :  { %1041 = vmatpush3.bf16.msra.mxu1 %v1040_v26  ;;  %v529_v26 = vld [vmem:[%s1637_s6 + $0x48] sm:$0xff] }
 0x105   :  { %1042 = vmatprep.subr.bf16.mxu1 %v1158_v3  ;;  %v1094_v27 = vpack.c.bf16 %v529_v26, %v528_v25 }
 0x108   :  { %1044 = vmatpush3.bf16.msra.mxu1 %v1043_v29  ;;  %v531_v29 = vld [vmem:[%s1637_s6 + $0x58] sm:$0xff] }
 0x109   :  { %1045 = vmatprep.subr.bf16.mxu1 %v1158_v3  ;;  %v1097_v30 = vpack.c.bf16 %v531_v29, %v530_v28 }
 0x10c   :  { %1047 = vmatpush3.bf16.msra.mxu1 %v1046_v32  ;;  %v533_v32 = vld [vmem:[%s1637_s6 + $0x68] sm:$0xff] }
 0x10d   :  { %1048 = vmatprep.subr.bf16.mxu1 %v1158_v3  ;;  %v1100_v33 = vpack.c.bf16 %v533_v32, %v532_v31 }
 0x110   :  { %1050 = vmatpush3.bf16.msra.mxu1 %v1049_v35 }
 0x111   :  { %1051 = vmatprep.subr.bf16.mxu1 %v1158_v3 }
 0x114   :  { %1053 = vmatpush3.bf16.msra.mxu1 %v1052_v38 }
 0x115   :  { %1054 = vmatprep.subr.bf16.mxu1 %v1158_v3 }
 0x118   :  { %1056 = vmatpush3.bf16.msra.mxu1 %v1055_v46 }
 0x119   :  { %1081 = vmatprep.subr.bf16.mxu1 %v1158_v3 }
 0x1ce   :  { %v232_v40 = vpop.f32.mrb[0].mxu1 }
 0x1cf   :  { %v233_v41 = vadd.f32 %v644_v39, %v232_v40  ;;  %v820_v42 = vpop.f32.mrb[1].mxu1  ;;  %v534_v39 = vld [vmem:[%s1637_s6 + $0x70] sm:$0xff]  ;;  %v535_v40 = vld [vmem:[%s1637_s6 + $0x78] sm:$0xff] }
 0x1d1   :  { %v236_v43 = vmax.f32 %v233_v41, 0.0  ;;  %v1103_v41 = vpack.c.bf16 %v535_v40, %v534_v39 }
 0x1d3   :  { %854 = vmatmul.mubr.f32.vlgmr.msra.gmra.mrb[2].mxu0 %v236_v43 }
 0x1d4   :  { %923 = vmatprep.mubr.msk.f32.mxu0 %vm1159_vm0, %v1160_v6  ;;  %1059 = vmatpush3.bf16.msra.mxu0 %v1058_v50 }
 0x1d5   :  { %1060 = vmatprep.subr.bf16.mxu0 %v1158_v3 }
 0x1d8   :  { %1062 = vmatpush3.bf16.msra.mxu0 %v1061_v52 }
 0x1d9   :  { %1063 = vmatprep.subr.bf16.mxu0 %v1158_v3 }
 0x1dc   :  { %1065 = vmatpush3.bf16.msra.mxu0 %v1064_v55 }
 0x1dd   :  { %1066 = vmatprep.subr.bf16.mxu0 %v1158_v3 }
 0x1e0   :  { %1068 = vmatpush3.bf16.msra.mxu0 %v1067_v58 }
 0x1e1   :  { %1069 = vmatprep.subr.bf16.mxu0 %v1158_v3 }
 0x1e4   :  { %1071 = vmatpush3.bf16.msra.mxu0 %v1070_v61 }
 0x1e5   :  { %1072 = vmatprep.subr.bf16.mxu0 %v1158_v3 }
 0x1e8   :  { %1074 = vmatpush3.bf16.msra.mxu0 %v1073_v0 }
 0x1e9   :  { %1075 = vmatprep.subr.bf16.mxu0 %v1158_v3 }
 0x1ec   :  { %1077 = vmatpush3.bf16.msra.mxu0 %v1076_v4 }
 0x1ed   :  { %1078 = vmatprep.subr.bf16.mxu0 %v1158_v3 }
 0x1f0   :  { %1080 = vmatpush3.bf16.msra.mxu0 %v1079_v13 }
 0x2a6   :  { %v326_v7 = vpop.f32.mrb[2].mxu0 }
 0x2a7   :  { %v327_v8 = vadd.f32 %v645_v5, %v326_v7  ;;  %v855_v9 = vpop.f32.mrb[3].mxu0 }
 0x2a9   :  { %v330_v10 = vmax.f32 %v327_v8, 0.0 }
 0x2ab   :  { %331 = vst [vmem:[#allocation2] sm:$0xff] %v330_v10  ;;  %889 = vmatmul.mubr.f32.vlgmr.msra.gmra.mrb[2].mxu1 %v330_v10 }
 0x2ac   :  { %958 = vmatprep.mubr.msk.f32.mxu1 %vm1159_vm0, %v1160_v6  ;;  %v522_v6 = vld [vmem:[%s1637_s6 + $0x10] sm:$0xff]  ;;  %1083 = vmatpush3.bf16.msra.mxu1 %v1082_v16 }
 0x2ad   :  { %v1085_v18 = vpack.c.bf16 %v523_v17, %v522_v6  ;;  %1084 = vmatprep.subr.bf16.mxu1 %v1158_v3 }
 0x2b0   :  { %1086 = vmatpush3.bf16.msra.mxu1 %v1085_v18 }
 0x2b1   :  { %1087 = vmatprep.subr.bf16.mxu1 %v1158_v3 }
 0x2b4   :  { %1089 = vmatpush3.bf16.msra.mxu1 %v1088_v21 }
 0x2b5   :  { %1090 = vmatprep.subr.bf16.mxu1 %v1158_v3 }
 0x2b8   :  { %1092 = vmatpush3.bf16.msra.mxu1 %v1091_v24 }
 0x2b9   :  { %1093 = vmatprep.subr.bf16.mxu1 %v1158_v3 }
 0x2bc   :  { %1095 = vmatpush3.bf16.msra.mxu1 %v1094_v27 }
 0x2bd   :  { %1096 = vmatprep.subr.bf16.mxu1 %v1158_v3 }
 0x2c0   :  { %1098 = vmatpush3.bf16.msra.mxu1 %v1097_v30 }
 0x2c1   :  { %1099 = vmatprep.subr.bf16.mxu1 %v1158_v3 }
 0x2c4   :  { %1101 = vmatpush3.bf16.msra.mxu1 %v1100_v33 }
 0x2c5   :  { %1102 = vmatprep.subr.bf16.mxu1 %v1158_v3  ;;  %v647_v3 = vld [vmem:[%s1642_s11] ss:$0 sm:$0xff] }
 0x2c8   :  { %1104 = vmatpush3.bf16.msra.mxu1 %v1103_v41 }
 0x37e   :  { %v421_v35 = vpop.f32.mrb[2].mxu1 }
 0x37f   :  { %v422_v36 = vadd.f32 %v646_v34, %v421_v35  ;;  %v890_v37 = vpop.f32.mrb[3].mxu1 }
 0x381   :  { %v425_v38 = vmax.f32 %v422_v36, 0.0 }
 0x383   :  { %924 = vmatmul.mubr.f32.vlgmr.msra.gmra.mrb[4].mxu0 %v425_v38 }
 0x456   :  { %v515_v42 = vpop.f32.mrb[4].mxu0 }
 0x457   :  { %v516_v43 = vadd.f32 %v647_v3, %v515_v42  ;;  %v925_v44 = vpop.f32.mrb[5].mxu0 }
 0x459   :  { %v519_v45 = vmax.f32 %v516_v43, 0.0 }
 0x45b   :  { %959 = vmatmul.mubr.f32.vlgmr.msra.gmra.mrb[4].mxu1 %v519_v45 }
 0x45c   :  { %1121 = shalt.err (!%p1118_p4)
}
 0x45d   :  { %s1122_s8 = scalar_lea.hbm %s1644_s13, 128 }
 0x45e   :  { %p1123_p5 = scmp.ne.s32.totalorder %s1644_s13, %s1122_s8  ;;  %p1126_p6 = scmp.lt.u32.totalorder %s1122_s8, %s1644_s13 }
 0x460   :  { %p1128_p7 = pnand %p1126_p6, %p1123_p5 }
 0x462   :  { %1131 = shalt.err (!%p1128_p7)
}
 0x463   :  { %624 = dma.vmem_to_hbm [thread:$0]  %s622_s17, 128, %s1644_s13, [#allocation3]   ;;  %v648_v46 = vld [vmem:[%s1643_s12] ss:$0 sm:$0xff] }
 0x464   :  { %s1162_s4 = smov [#allocation4]  }
 0x465   :  { %s631_s25 = sshll.u32 %s1162_s4, 4  ;;  %s632_s25 = int_to_ptr.vmem [resolvable:$true] %s631_s25 }
 0x466   :  { %s1132_s7 = scalar_lea.vmem %s632_s25, 128  ;;  %p1137_p9 = scmp.lt.s32.totalorder %s632_s25, %s632_s25 }
 0x467   :  { %p1133_p8 = scmp.ne.s32.totalorder %s632_s25, %s1132_s7  ;;  %p1138_p10 = scmp.lt.s32.totalorder %s1132_s7, %s1132_s7 }
 0x469   :  { %p1139_p11 = por %p1138_p10, %p1137_p9 }
 0x46b   :  { %p1140_p12 = pnand %p1139_p11, %p1133_p8 }
 0x52e   :  { %v609_v47 = vpop.f32.mrb[4].mxu1 }
 0x52f   :  { %v610_v48 = vadd.f32 %v648_v46, %v609_v47  ;;  %v960_v49 = vpop.f32.mrb[5].mxu1 }
 0x531   :  { %v613_v50 = vmax.f32 %v610_v48, 0.0 }
 0x533   :  { %614 = vst [vmem:[#allocation4] sm:$0xff] %v613_v50 }
 0x534   :  { %1143 = shalt.err (!%p1140_p12)
}
 0x535   :  { %s1144_s26 = scalar_lea.hbm %s1645_s14, 128 }
 0x536   :  { %p1145_p13 = scmp.ne.s32.totalorder %s1645_s14, %s1144_s26  ;;  %p1148_p0 = scmp.lt.u32.totalorder %s1144_s26, %s1645_s14 }
 0x538   :  { %p1150_p1 = pnand %p1148_p0, %p1145_p13 }
 0x53a   :  { %1153 = shalt.err (!%p1150_p1)
}
 0x53b   :  { %634 = dma.vmem_to_hbm [thread:$0]  %s632_s25, 128, %s1645_s14, [#allocation5]  }
 0x53c   :  { %1154 = dma.done.wait [#allocation3], 128  }
 0x53d   :  { %1155 = vsyncadd [#allocation3], 4294967168 }
 0x53e   :  { %1156 = dma.done.wait [#allocation5], 128  }
 0x53f   :  { %1157 = vsyncadd [#allocation5], 4294967168 }
 0x540   :  { %641 = vsyncpa [#allocation3], 1 }
 0x541   :  { %642 = vsyncpa [#allocation5], 1 }

</bundles_post_ra>
